<compile_context>
chip_gen: v6e
topology: v6e:2x2x1
jax: 0.10.0
libtpu: 0.0.40
codegen_flags: <defaults>
</compile_context>

<pallas_src>
import jax
import jax.numpy as jnp
from jax import lax
from jax.experimental import pallas as pl
from jax.experimental.pallas import tpu as pltpu


def _round_up(x, m):
    return ((x + m - 1) // m) * m


def _disc_kernel(x_ref, w1_ref, b1_ref, w2_ref, b2_ref, o_ref):
    # In-VMEM cast of the x tile (no standalone XLA cast pass over HBM).
    x = x_ref[...].astype(jnp.bfloat16)
    # First linear on the MXU: bf16 operands, f32 accumulation.
    h = jnp.dot(x, w1_ref[...], preferred_element_type=jnp.float32)     # (TILE_B, 128)
    h = h + b1_ref[...]                                                  # + (1, 128)
    # LeakyReLU(0.1): max(h, 0.1*h) is exact and a single vmax.
    h = jnp.maximum(h, 0.1 * h)
    # Second linear (128 -> 1) on the MXU, transposed form:
    # (1,128) contracted against (TILE_B,128) on the last axis -> (1, TILE_B),
    # a lane-dense result (no XLU cross-lane reduce, no masked partial stores).
    z = lax.dot_general(
        w2_ref[...], h.astype(jnp.bfloat16),
        dimension_numbers=(((1,), (1,)), ((), ())),
        preferred_element_type=jnp.float32,
    )                                                                    # (1, TILE_B)
    z = z + b2_ref[...]
    # Clamp so exp(-z) cannot overflow to +inf before the approx reciprocal.
    z = jnp.clip(z, -30.0, 30.0)
    # Sigmoid: exp on the EUP; divide via approximate reciprocal (EUP slot, ~free).
    o_ref[...] = pl.reciprocal(1.0 + jnp.exp(-z), approx=True).astype(o_ref.dtype)


def prepare_params(w1, b1, w2, b2):
    """One-time re-layout of PyTorch nn.Linear params (outside the forward).

    w1: (128, img_dim), b1: (128,), w2: (1, 128), b2: (1,).
    Returns: w1_t (img_dim,128) bf16, b1 (1,128) f32, w2_row (1,128) bf16,
             b2 (1,1) f32.
    """
    hidden, _ = w1.shape
    out_dim = w2.shape[0]
    w1_t = jnp.asarray(w1, jnp.float32).T.astype(jnp.bfloat16)            # (img_dim, 128)
    b1_2d = jnp.asarray(b1, jnp.float32).reshape(1, hidden)               # (1, 128)
    w2_row = jnp.asarray(w2, jnp.float32).reshape(out_dim, hidden).astype(jnp.bfloat16)
    b2_2d = jnp.asarray(b2, jnp.float32).reshape(1, out_dim)              # (1, 1)
    return w1_t, b1_2d, w2_row, b2_2d


def _pick_tile_b(b_pad, cap):
    """Largest multiple of 8 that divides b_pad and is <= cap."""
    t = min(cap, b_pad)
    t = max(8, (t // 8) * 8)
    while t > 8 and b_pad % t != 0:
        t -= 8
    return t


def discriminator_forward(x, params, *, tile_b_cap=1024):
    """x: (B, img_dim) f32. params: output of prepare_params. Returns (B, 1) f32."""
    w1_t, b1_2d, w2_row, b2_2d = params
    B, img_dim = x.shape
    hidden = w1_t.shape[1]
    out_dim = b2_2d.shape[1]

    # Pad batch only to the sublane multiple (<= 7 extra rows; essentially free).
    b_pad = _round_up(B, 8)
    if b_pad != B:
        x = jnp.pad(x, ((0, b_pad - B), (0, 0)))

    # Keep per-tile x footprint (f32, lanes padded to 128, double-buffered) modest
    # so even v7x's 64 MiB VMEM has plenty of headroom.
    lane_dim = _round_up(img_dim, 128)
    vmem_tile_budget = 24 << 20                       # budget for the 2 x-tile buffers
    cap_from_vmem = max(8, (vmem_tile_budget // (2 * lane_dim * 4)) // 8 * 8)
    cap = min(tile_b_cap, cap_from_vmem)
    # >= 2 grid steps when possible so the "parallel" axis can split across
    # the 2 TensorCores on v7x.
    if b_pad >= 16:
        cap = min(cap, b_pad // 2)
    tile_b = _pick_tile_b(b_pad, cap)
    num_tiles = b_pad // tile_b
    grid = (num_tiles,)

    # VMEM accounting WITH lane/sublane padding.
    x_tile_bytes = tile_b * lane_dim * 4                                  # f32 x tile
    out_tile_bytes = 8 * _round_up(tile_b, 128) * 4                       # (1,tile_b) f32
    w1_bytes = _round_up(img_dim, 16) * _round_up(hidden, 128) * 2        # bf16 resident
    small_bytes = 3 * 16 * 128 * 4                                        # b1, w2, b2 tiles
    vmem_bytes = (2 * x_tile_bytes          # x, double-buffered
                  + 2 * out_tile_bytes      # out, double-buffered
                  + 2 * w1_bytes            # w1 (conservative: 2 buffers)
                  + 2 * small_bytes)
    vmem_limit = int(min(64 << 20, max(16 << 20, vmem_bytes + (4 << 20))))

    cost = pl.CostEstimate(
        flops=2 * b_pad * img_dim * hidden + 2 * b_pad * hidden + 4 * b_pad * hidden,
        transcendentals=b_pad * out_dim,
        bytes_accessed=(b_pad * img_dim * 4            # x (f32)
                        + img_dim * hidden * 2         # w1 (bf16)
                        + b_pad * 4),                  # output (f32)
    )

    out = pl.pallas_call(
        _disc_kernel,
        out_shape=jax.ShapeDtypeStruct((num_tiles, tile_b), jnp.float32),
        grid=grid,
        in_specs=[
            pl.BlockSpec((tile_b, img_dim), lambda i: (i, 0)),    # x: streamed per tile
            pl.BlockSpec((img_dim, hidden), lambda i: (0, 0)),    # w1: VMEM-resident
            pl.BlockSpec((1, hidden), lambda i: (0, 0)),          # b1: resident
            pl.BlockSpec((out_dim, hidden), lambda i: (0, 0)),    # w2 row: resident
            pl.BlockSpec((1, out_dim), lambda i: (0, 0)),         # b2: resident
        ],
        out_specs=pl.BlockSpec((1, tile_b), lambda i: (i, 0)),    # lane-dense out rows
        compiler_params=pltpu.CompilerParams(
            dimension_semantics=("parallel",),
            vmem_limit_bytes=vmem_limit,
        ),
        cost_estimate=cost,
    )(x, w1_t, b1_2d, w2_row, b2_2d)

    # (num_tiles, tile_b) rows are consecutive batch chunks -> flatten and trim.
    return out.reshape(-1, 1)[:B]


def reference_forward(x, w1, b1, w2, b2):
    h = x @ w1.T + b1
    h = jnp.where(h > 0, h, 0.1 * h)
    z = h @ w2.T + b2
    return jax.nn.sigmoid(z)


if __name__ == "__main__":
    key = jax.random.PRNGKey(0)
    k_x, k_w1, k_b1, k_w2, k_b2 = jax.random.split(key, 5)

    B = 8
    img_dim = 256          # small flattened image, consistent with Linear(img_dim, 128)
    hidden = 128
    out_dim = 1

    x = jax.random.normal(k_x, (B, img_dim), dtype=jnp.float32)
    # PyTorch nn.Linear shapes: (out_features, in_features) and (out_features,)
    w1 = jax.random.normal(k_w1, (hidden, img_dim), dtype=jnp.float32) * 0.05
    b1 = jax.random.normal(k_b1, (hidden,), dtype=jnp.float32) * 0.05
    w2 = jax.random.normal(k_w2, (out_dim, hidden), dtype=jnp.float32) * 0.05
    b2 = jax.random.normal(k_b2, (out_dim,), dtype=jnp.float32) * 0.05

    params = prepare_params(w1, b1, w2, b2)   # one-time re-layout (not per forward)

    out = discriminator_forward(x, params)
    jax.block_until_ready(out)

    ref = reference_forward(x, w1, b1, w2, b2)
    assert out.shape == (B, out_dim), out.shape
    # Tolerance loosened vs the f32 reference: bf16 matmul operands (f32 accumulation)
    # and the EUP approximate reciprocal in the sigmoid.
    assert jnp.allclose(out, ref, atol=2e-2, rtol=2e-2), "mismatch vs reference"

    print("KERNEL_OK")
</pallas_src>

<mosaic_0001>
module attributes {stable_mosaic.version = 11 : i64} {
  func.func @_disc_kernel(%arg0: i32, %arg1: memref<8x256xf32, #tpu.memory_space<vmem>>, %arg2: memref<256x128xbf16, #tpu.memory_space<vmem>>, %arg3: memref<1x128xf32, #tpu.memory_space<vmem>>, %arg4: memref<1x128xbf16, #tpu.memory_space<vmem>>, %arg5: memref<1x1xf32, #tpu.memory_space<vmem>>, %arg6: memref<1x8xf32, #tpu.memory_space<vmem>>) attributes {dimension_semantics = [#tpu.dimension_semantics<parallel>], iteration_bounds = array<i64: 1>, scalar_prefetch = 0 : i64, scratch_operands = 0 : i64, tpu.core_type = #tpu.core_type<tc>, window_params = [{transform_indices = @transform_0, window_bounds = array<i64: 8, 256>}, {pipeline_mode = #tpu.pipeline_mode<synchronous>, transform_indices = @transform_1, window_bounds = array<i64: 256, 128>}, {pipeline_mode = #tpu.pipeline_mode<synchronous>, transform_indices = @transform_2, window_bounds = array<i64: 1, 128>}, {pipeline_mode = #tpu.pipeline_mode<synchronous>, transform_indices = @transform_3, window_bounds = array<i64: 1, 128>}, {pipeline_mode = #tpu.pipeline_mode<synchronous>, transform_indices = @transform_4, window_bounds = array<i64: 1, 1>}, {transform_indices = @transform_5, window_bounds = array<i64: 1, 8>}]} {
    %c0 = arith.constant 0 : index
    %c0_0 = arith.constant 0 : index
    %0 = vector.load %arg1[%c0, %c0_0] : memref<8x256xf32, #tpu.memory_space<vmem>>, vector<8x256xf32>
    %1 = arith.truncf %0 : vector<8x256xf32> to vector<8x256xbf16>
    %c0_1 = arith.constant 0 : index
    %c0_2 = arith.constant 0 : index
    %2 = vector.load %arg2[%c0_1, %c0_2] : memref<256x128xbf16, #tpu.memory_space<vmem>>, vector<256x128xbf16>
    %cst = arith.constant dense<0.000000e+00> : vector<8x128xf32>
    %3 = tpu.matmul %1, %2, %cst {dimension_numbers = #tpu.dot_dimension_numbers<[1], [0], [0], [1], [0, 0, 1, 1], [], []>} : vector<8x256xbf16>, vector<256x128xbf16>, vector<8x128xf32> -> vector<8x128xf32>
    %c0_3 = arith.constant 0 : index
    %c0_4 = arith.constant 0 : index
    %4 = vector.load %arg3[%c0_3, %c0_4] : memref<1x128xf32, #tpu.memory_space<vmem>>, vector<1x128xf32>
    %5 = vector.broadcast %4 : vector<1x128xf32> to vector<8x128xf32>
    %6 = arith.addf %3, %5 : vector<8x128xf32>
    %cst_5 = arith.constant 1.000000e-01 : f32
    %7 = vector.broadcast %cst_5 : f32 to vector<8x128xf32>
    %8 = arith.mulf %7, %6 : vector<8x128xf32>
    %9 = arith.maximumf %6, %8 : vector<8x128xf32>
    %c0_6 = arith.constant 0 : index
    %c0_7 = arith.constant 0 : index
    %10 = vector.load %arg4[%c0_6, %c0_7] : memref<1x128xbf16, #tpu.memory_space<vmem>>, vector<1x128xbf16>
    %11 = arith.truncf %9 : vector<8x128xf32> to vector<8x128xbf16>
    %cst_8 = arith.constant dense<0.000000e+00> : vector<1x8xf32>
    %12 = tpu.matmul %10, %11, %cst_8 {dimension_numbers = #tpu.dot_dimension_numbers<[1], [1], [0], [0], [0, 0, 1, 0], [], []>} : vector<1x128xbf16>, vector<8x128xbf16>, vector<1x8xf32> -> vector<1x8xf32>
    %c0_9 = arith.constant 0 : index
    %c0_10 = arith.constant 0 : index
    %13 = vector.load %arg5[%c0_9, %c0_10] : memref<1x1xf32, #tpu.memory_space<vmem>>, vector<1x1xf32>
    %14 = vector.broadcast %13 : vector<1x1xf32> to vector<1x8xf32>
    %15 = arith.addf %12, %14 : vector<1x8xf32>
    %cst_11 = arith.constant -3.000000e+01 : f32
    %cst_12 = arith.constant 3.000000e+01 : f32
    %16 = vector.broadcast %cst_11 : f32 to vector<1x8xf32>
    %17 = arith.maximumf %16, %15 : vector<1x8xf32>
    %18 = vector.broadcast %cst_12 : f32 to vector<1x8xf32>
    %19 = arith.minimumf %18, %17 : vector<1x8xf32>
    %cst_13 = arith.constant 0.000000e+00 : f32
    %20 = vector.broadcast %cst_13 : f32 to vector<1x8xf32>
    %21 = arith.subf %20, %19 : vector<1x8xf32>
    %22 = math.exp %21 : vector<1x8xf32>
    %cst_14 = arith.constant 1.000000e+00 : f32
    %23 = vector.broadcast %cst_14 : f32 to vector<1x8xf32>
    %24 = arith.addf %23, %22 : vector<1x8xf32>
    %25 = tpu.reciprocal %24 {approx = true} : vector<1x8xf32> -> vector<1x8xf32>
    %c0_15 = arith.constant 0 : index
    %c0_16 = arith.constant 0 : index
    %26 = vector.load %arg6[%c0_15, %c0_16] : memref<1x8xf32, #tpu.memory_space<vmem>>, vector<1x8xf32>
    tpu.vector_store %arg6[%c0_15, %c0_16], %25 {strides = array<i32>} : memref<1x8xf32, #tpu.memory_space<vmem>>, vector<1x8xf32>,
    return
  }
  func.func @transform_0(%arg0: i32) -> (i32, i32) {
    %c0_i32 = arith.constant 0 : i32
    %c0_i32_0 = arith.constant 0 : i32
    return %arg0, %c0_i32 : i32, i32
  }
  func.func @transform_1(%arg0: i32) -> (i32, i32) {
    %c0_i32 = arith.constant 0 : i32
    %c0_i32_0 = arith.constant 0 : i32
    %c0_i32_1 = arith.constant 0 : i32
    return %c0_i32, %c0_i32_0 : i32, i32
  }
  func.func @transform_2(%arg0: i32) -> (i32, i32) {
    %c0_i32 = arith.constant 0 : i32
    %c0_i32_0 = arith.constant 0 : i32
    %c0_i32_1 = arith.constant 0 : i32
    return %c0_i32, %c0_i32_0 : i32, i32
  }
  func.func @transform_3(%arg0: i32) -> (i32, i32) {
    %c0_i32 = arith.constant 0 : i32
    %c0_i32_0 = arith.constant 0 : i32
    %c0_i32_1 = arith.constant 0 : i32
    return %c0_i32, %c0_i32_0 : i32, i32
  }
  func.func @transform_4(%arg0: i32) -> (i32, i32) {
    %c0_i32 = arith.constant 0 : i32
    %c0_i32_0 = arith.constant 0 : i32
    %c0_i32_1 = arith.constant 0 : i32
    return %c0_i32, %c0_i32_0 : i32, i32
  }
  func.func @transform_5(%arg0: i32) -> (i32, i32) {
    %c0_i32 = arith.constant 0 : i32
    %c0_i32_0 = arith.constant 0 : i32
    return %arg0, %c0_i32 : i32, i32
  }
}

</mosaic_0001>

<bundles_post_ra>
// kernel: tpu_custom_call.1
= control target key start
LH: loop header
LB: loop body
LE: loop exit
PB: predicated region body
PF: predicated region fallthrough
CT: control target
= control target key end

     0   :  { %s507_s0 = inlined_call_operand.hbm [shape: f32[8,256], index: 0, kind: input, shape index: {}]   ;;  %s508_s1 = inlined_call_operand.hbm [shape: bf16[256,128], index: 1, kind: input, shape index: {}]   ;;  %s509_s2 = inlined_call_operand.vmem [shape: f32[1,128], index: 2, kind: input, shape index: {}]   ;;  %s510_s3 = inlined_call_operand.vmem [shape: bf16[1,128], index: 3, kind: input, shape index: {}]   ;;  %s511_s4 = inlined_call_operand.<no memory space> [shape: f32[1,1], index: 4, kind: input, shape index: {}]   ;;  %s512_s5 = inlined_call_operand.hbm [shape: f32[1,8], index: 5, kind: output, shape index: {}]  }
   0x1   :  { %v10_v0 = vstv %s511_s4 }
   0x2   :  { %11 = vst [vmem:[#allocation2] sm:$0x1] %v10_v0 }
   0x3   :  { %12 = vsyncpa [#allocation4], 0 }
   0x4   :  { %13 = vsyncpa [#allocation7], 0 }
   0x5   :  { %14 = vsyncpa [#allocation5], 0  ;;  %s451_s20 = smov [#allocation3]   ;;  %s452_s22 = smov [#allocation6]  }
   0x6   :  { %s21_s21 = sshll.u32 %s451_s20, 4  ;;  %s30_s23 = sshll.u32 %s452_s22, 4  ;;  %s22_s21 = int_to_ptr.vmem [resolvable:$true] %s21_s21  ;;  %s31_s23 = int_to_ptr.vmem [resolvable:$true] %s30_s23 }
   0x7   :  { %s393_s24 = scalar_lea.vmem %s22_s21, 256  ;;  %p398_p1 = scmp.lt.s32.totalorder %s22_s21, %s22_s21 }
   0x8   :  { %p394_p0 = scmp.ne.s32.totalorder %s22_s21, %s393_s24  ;;  %p399_p2 = scmp.lt.s32.totalorder %s393_s24, %s393_s24 }
   0xa   :  { %p400_p3 = por %p399_p2, %p398_p1 }
   0xc   :  { %p401_p4 = pnand %p400_p3, %p394_p0 }
   0xe   :  { %404 = shalt.err (!%p401_p4)
}
   0xf   :  { %24 = dma.hbm_to_vmem [thread:$0]  %s507_s0, 256, %s22_s21, [#allocation4]  }
  0x10   :  { %s413_s4 = scalar_lea.vmem %s31_s23, 2048  ;;  %p418_p6 = scmp.lt.s32.totalorder %s31_s23, %s31_s23 }
  0x11   :  { %p414_p5 = scmp.ne.s32.totalorder %s31_s23, %s413_s4  ;;  %p419_p7 = scmp.lt.s32.totalorder %s413_s4, %s413_s4 }
  0x13   :  { %p420_p8 = por %p419_p7, %p418_p6 }
  0x15   :  { %p421_p9 = pnand %p420_p8, %p414_p5 }
  0x17   :  { %424 = shalt.err (!%p421_p9)
}
  0x18   :  { %s453_s27 = smov 64   ;;  %s454_s28 = smov 4  }
  0x19   :  { %36 = dma.hbm_to_vmem [thread:$0]  %s508_s1, 2048, %s31_s23, [#allocation7], %s453_s27, %s453_s27, %s454_s28  }
  0x1a   :  { %445 = dma.done.wait [#allocation4], 256  }
  0x1b   :  { %446 = vsyncadd [#allocation4], 4294967040 }
  0x1c   :  { %447 = dma.done.wait [#allocation7], 2048  }
  0x1d   :  { %448 = vsyncadd [#allocation7], 4294965248  ;;  %v365_v1 = vld [vmem:[#allocation6 + $0x78] sm:$0xff]   ;;  %v367_v3 = vld [vmem:[#allocation6 + $0x70] sm:$0xff]   ;;  %v455_v21 = vmov 0.0   ;;  %vm456_vm0 = vmmov 0   ;;  %v239_v35 = vlaneseq }
  0x1e   :  { %v366_v2 = vld [vmem:[#allocation6 + $0x38] sm:$0xff]   ;;  %326 = vmatprep.subr.bf16.mxu0 %v365_v1  ;;  %v368_v4 = vld [vmem:[#allocation6 + $0x30] sm:$0xff]   ;;  %v369_v5 = vld [vmem:[#allocation6 + $0x68] sm:$0xff]   ;;  %350 = vmatprep.subr.bf16.mxu1 %v455_v21  ;;  %v457_v23 = vmov 0   ;;  %vm290_vm1 = vcmask 57344  }
  0x1f   :  { %327 = vmatpush3.bf16.msra.mxu0 %v366_v2  ;;  %v370_v6 = vld [vmem:[#allocation6 + $0x28] sm:$0xff]   ;;  %v371_v7 = vld [vmem:[#allocation6 + $0x60] sm:$0xff]   ;;  %v373_v9 = vld [vmem:[#allocation6 + $0x58] sm:$0xff]   ;;  %352 = vmatprep.mubr.msk.bf16.mxu1 %vm456_vm0, %v455_v21  ;;  %v240_v36 = vshrl.u32 %v239_v35, 7 }
  0x20   :  { %328 = vmatprep.subr.bf16.mxu0 %v367_v3  ;;  %v372_v8 = vld [vmem:[#allocation6 + $0x20] sm:$0xff]   ;;  %v374_v10 = vld [vmem:[#allocation6 + $0x18] sm:$0xff]   ;;  %v375_v11 = vld [vmem:[#allocation6 + $0x50] sm:$0xff]   ;;  %364 = vset.pattern.permute.xlu0 %v457_v23 }
  0x21   :  { %v51_v12 = vld [vmem:[#allocation3 + $0x8] sm:$0xff]  ;;  %v376_v14 = vld [vmem:[#allocation6 + $0x10] sm:$0xff]   ;;  %v377_v15 = vld [vmem:[#allocation6 + $0x48] sm:$0xff]   ;;  %v241_v37 = vsub.s32 0, %v240_v36 }
  0x22   :  { %v53_v13 = vpack.c.bf16 %v51_v12, %v51_v12  ;;  %v378_v16 = vld [vmem:[#allocation6 + $0x8] sm:$0xff]   ;;  %v379_v17 = vld [vmem:[#allocation6 + $0x40] sm:$0xff]   ;;  %v50_v19 = vld [vmem:[#allocation3] sm:$0xff] }
  0x23   :  { %329 = vmatpush3.bf16.msra.mxu0 %v368_v4  ;;  %v380_v18 = vld [vmem:[#allocation6] sm:$0xff]   ;;  %v52_v20 = vpack.c.bf16 %v50_v19, %v50_v19  ;;  %v233_v22 = vld [vmem:[#allocation2] sm:$0x1] }
  0x24   :  { %330 = vmatprep.subr.bf16.mxu0 %v369_v5  ;;  %221 = vmatprep.mubr.bf16.mxu0 %v53_v13  ;;  %v308_v25 = vld [vmem:[%s509_s2] ss:$0 sm:$0xff]  ;;  %s458_s2 = smov [#allocation8]  }
  0x25   :  { %236 = vperm.xlu0 %364, %v233_v22   ;;  %v231_v34 = vld [vmem:[%s510_s3] sm:$0x1]  ;;  %s298_s3 = sshll.u32 %s458_s2, 4  ;;  %s299_s3 = int_to_ptr.vmem [resolvable:$true] %s298_s3 }
  0x26   :  { %s425_s8 = scalar_lea.vmem %s299_s3, 16  ;;  %s429_s9 = scalar_lea.vmem %s299_s3, 32 }
  0x27   :  { %331 = vmatpush3.bf16.msra.mxu0 %v370_v6  ;;  %p426_p10 = scmp.ne.s32.totalorder %s299_s3, %s425_s8  ;;  %p430_p11 = scmp.lt.s32.totalorder %s299_s3, %s299_s3 }
  0x28   :  { %332 = vmatprep.subr.bf16.mxu0 %v371_v7  ;;  %p431_p12 = scmp.lt.s32.totalorder %s429_s9, %s425_s8 }
  0x2a   :  { %p432_p13 = por %p431_p12, %p430_p11 }
  0x2b   :  { %333 = vmatpush3.bf16.msra.mxu0 %v372_v8 }
  0x2c   :  { %334 = vmatprep.subr.bf16.mxu0 %v373_v9  ;;  %p433_p0 = pnand %p432_p13, %p426_p10 }
  0x2f   :  { %335 = vmatpush3.bf16.msra.mxu0 %v374_v10 }
  0x30   :  { %336 = vmatprep.subr.bf16.mxu0 %v375_v11 }
  0x33   :  { %337 = vmatpush3.bf16.msra.mxu0 %v376_v14 }
  0x34   :  { %338 = vmatprep.subr.bf16.mxu0 %v377_v15 }
  0x37   :  { %339 = vmatpush3.bf16.msra.mxu0 %v378_v16 }
  0x38   :  { %340 = vmatprep.subr.bf16.mxu0 %v379_v17 }
  0x3b   :  { %341 = vmatpush3.bf16.msra.mxu0 %v380_v18 }
  0x3e   :  { %222 = vmatmul.mubr.bf16.vlgmr.msra.gmra.mxu0 %v52_v20 }
  0xa0   :  { %v237_v38 = vpop.permute.xlu0 %236 }
  0xa1   :  { %v242_v39 = vrot.slane %v237_v38, %v241_v37 }
  0xfe   :  { %v342_v24 = vpop.f32.mrf.mxu0 }
 0x100   :  { %v343_v26 = vpop.f32.mrf.mxu0 }
 0x101   :  { %v344_v27 = vadd.f32 %v343_v26, %v342_v24 }
 0x102   :  { %v345_v28 = vpop.f32.mrf.mxu0 }
 0x103   :  { %v224_v29 = vadd.f32 %v344_v27, %v308_v25 }
 0x104   :  { %v346_v30 = vpop.f32.mrf.mxu0 }
 0x105   :  { %v229_v31 = vmul.f32 0.1, %v224_v29 }
 0x107   :  { %v230_v32 = vmax.f32 %v224_v29, %v229_v31 }
 0x109   :  { %v232_v33 = vpack.c.bf16 %v230_v32, %v230_v32 }
 0x10b   :  { %351 = vmatpush3.bf16.xpose.msra.mxu1 %v232_v33 }
 0x112   :  { %353 = vmatmul.mubr.bf16.vlgmr.msra.gmra.mxu1 %v231_v34 }
 0x1d2   :  { %v277_v40 = vpop.f32.mrf.mxu1 }
 0x1d3   :  { %v278_v41 = vadd.f32 %v277_v40, %v242_v39 }
 0x1d4   :  { %v354_v42 = vpop.f32.mrf.mxu1 }
 0x1d5   :  { %v325_v43 = vclamps-f32 %v278_v41, 30.0 }
 0x1d6   :  { %v280_v44 = vpop.f32.mrf.mxu1 }
 0x1d7   :  { %v285_v45 = vsub.f32 0.0, %v325_v43 }
 0x1d8   :  { %v355_v46 = vpop.f32.mrf.mxu1 }
 0x1d9   :  { %v286_v47 = vmul.f32 1.442695, %v285_v45 }
 0x1db   :  { %381 = vpow2.f32 %v286_v47 }
 0x1e8   :  { %v382_v48 = vpop.eup %381 }
 0x1e9   :  { %v288_v49 = vadd.f32 1.0, %v382_v48 }
 0x1eb   :  { %383 = vrcp.f32 %v288_v49 }
 0x1f8   :  { %v384_v50 = vpop.eup %383 }
 0x1f9   :  { %291 = vst.msk [vmem:[#allocation8] sm:$0x1] %vm290_vm1, %v384_v50 }
 0x1fa   :  { %436 = shalt.err (!%p433_p0)
}
 0x1fb   :  { %301 = dma.vmem_to_hbm [thread:$0]  %s299_s3, 16, %s512_s5, [#allocation5]  }
 0x1fc   :  { %449 = dma.done.wait [#allocation5], 16  }
 0x1fd   :  { %450 = vsyncadd [#allocation5], 4294967280 }
 0x1fe   :  { %305 = vsyncpa [#allocation4], 1 }
 0x1ff   :  { %306 = vsyncpa [#allocation7], 1 }
 0x200   :  { %307 = vsyncpa [#allocation5], 1 }

</bundles_post_ra>
